<compile_context>
chip_gen: v7x
topology: tpu7x:2x2x1
jax: 0.10.0
libtpu: 0.0.40
codegen_flags: <defaults>
</compile_context>

<pallas_src>
import jax
import jax.numpy as jnp
import numpy as np
from jax import lax
from jax.experimental import pallas as pl
from jax.experimental.pallas import tpu as pltpu


def _round_up(x: int, m: int) -> int:
    return ((x + m - 1) // m) * m


def _round_down(x: int, m: int) -> int:
    return (x // m) * m


def _hswish_math(x):
    # Same op order as torch: x * relu6(x + 3) / 6.0
    return (x * jnp.clip(x + 3.0, 0.0, 6.0)) / 6.0


def _make_2d_kernel(chunk_rows: int, n_chunks: int):
    """Elementwise kernel over a (tile_rows, 128) block, streamed in row-chunks."""

    def kernel(x_ref, o_ref):
        if n_chunks == 1:
            o_ref[...] = _hswish_math(x_ref[...])
        else:
            def body(c, carry):
                r0 = pl.multiple_of(c * chunk_rows, chunk_rows)
                x = x_ref[pl.ds(r0, chunk_rows), :]
                o_ref[pl.ds(r0, chunk_rows), :] = _hswish_math(x)
                return carry

            lax.fori_loop(0, n_chunks, body, 0)

    return kernel


def _hswish_kernel_1d(x_ref, o_ref):
    o_ref[...] = _hswish_math(x_ref[...])


def hswish(x: jax.Array, *, target_block_bytes: int = 8 << 20) -> jax.Array:
    """HSwish on an arbitrary-shaped array (NCHW conv feature maps expected)."""
    if x.size == 0:
        return x

    orig_shape = x.shape
    dtype = x.dtype
    itemsize = np.dtype(dtype).itemsize
    n = int(x.size)

    lanes = 128
    # Dtype-aware sublane packing multiple: 8 rows/vreg-tile for 32-bit,
    # 16 for 16-bit, 32 for 8-bit dtypes.
    sub = {4: 8, 2: 16, 1: 32}.get(itemsize, 8)
    chunk_rows = 64 * sub  # 256 KiB of rows per in-kernel streaming step

    common = dict(
        compiler_params=pltpu.CompilerParams(
            dimension_semantics=("parallel",),
            # 2 x (in + out) double-buffered 8 MiB blocks = 32 MiB + slack.
            vmem_limit_bytes=48 * 1024 * 1024,
        ),
        cost_estimate=pl.CostEstimate(
            flops=5 * n, transcendentals=0, bytes_accessed=2 * n * itemsize
        ),
    )

    flat = x.reshape(-1)  # metadata-only for a dense row-major array

    if n % lanes == 0:
        # ---- Fast path: lane-dense (rows, 128) 2D layout, no padding at all.
        rows = n // lanes
        x2d = flat.reshape(rows, lanes)
        rows_rounded = _round_up(rows, sub)

        # Target ~target_block_bytes per block, as a multiple of chunk_rows.
        tile_rows = max(
            chunk_rows,
            _round_down(target_block_bytes // (lanes * itemsize), chunk_rows),
        )
        # Megacore balance (v7x shards the "parallel" axis over 2 TCs): for
        # tensors with >= 4 chunks of data, cap the tile so the grid >= 4.
        if rows_rounded >= 4 * chunk_rows:
            tile_rows = min(
                tile_rows, _round_up(pl.cdiv(rows_rounded, 4), chunk_rows)
            )
        if tile_rows >= rows_rounded:
            tile_rows = rows_rounded  # whole array in one (maybe partial) block

        if tile_rows % chunk_rows == 0 and tile_rows > chunk_rows:
            kernel = _make_2d_kernel(chunk_rows, tile_rows // chunk_rows)
        else:
            kernel = _make_2d_kernel(tile_rows, 1)

        out2d = pl.pallas_call(
            kernel,
            out_shape=jax.ShapeDtypeStruct((rows, lanes), dtype),
            grid=(pl.cdiv(rows, tile_rows),),
            in_specs=[pl.BlockSpec((tile_rows, lanes), lambda i: (i, 0))],
            out_specs=pl.BlockSpec((tile_rows, lanes), lambda i: (i, 0)),
            **common,
        )(x2d)
        return out2d.reshape(orig_shape)

    # ---- Ragged path: n not a multiple of 128. 1D layout; the partial last
    # block is masked by Pallas, so there is still no pad / slice HBM pass.
    unit = sub * lanes  # elements per dense (sublane, lane) tile
    block_elems = min(
        _round_up(n, unit),
        max(unit, _round_down((512 * 1024) // itemsize, unit)),
    )
    out_flat = pl.pallas_call(
        _hswish_kernel_1d,
        out_shape=jax.ShapeDtypeStruct((n,), dtype),
        grid=(pl.cdiv(n, block_elems),),
        in_specs=[pl.BlockSpec((block_elems,), lambda i: (i,))],
        out_specs=pl.BlockSpec((block_elems,), lambda i: (i,)),
        **common,
    )(flat)
    return out_flat.reshape(orig_shape)


def _hswish_ref(x):
    return x * jnp.clip(x + 3.0, 0.0, 6.0) / 6.0


if __name__ == "__main__":
    key = jax.random.PRNGKey(0)
    # NCHW input, as a PyTorch conv feature map would be.
    x = jax.random.normal(key, (2, 4, 16, 16), dtype=jnp.float32) * 3.0

    out = hswish(x)
    jax.block_until_ready(out)

    ref = _hswish_ref(x)
    assert out.shape == x.shape and out.dtype == x.dtype
    assert jnp.allclose(out, ref, atol=1e-5, rtol=1e-6)

    print("KERNEL_OK")
</pallas_src>

<mosaic_0001>
module attributes {stable_mosaic.version = 11 : i64} {
  func.func @kernel(%arg0: i32, %arg1: memref<16x128xf32, #tpu.memory_space<vmem>>, %arg2: memref<16x128xf32, #tpu.memory_space<vmem>>) attributes {dimension_semantics = [#tpu.dimension_semantics<parallel>], iteration_bounds = array<i64: 1>, scalar_prefetch = 0 : i64, scratch_operands = 0 : i64, tpu.core_type = #tpu.core_type<tc>, window_params = [{transform_indices = @transform_0, window_bounds = array<i64: 16, 128>}, {transform_indices = @transform_1, window_bounds = array<i64: 16, 128>}]} {
    %c0 = arith.constant 0 : index
    %c0_0 = arith.constant 0 : index
    %0 = vector.load %arg1[%c0, %c0_0] : memref<16x128xf32, #tpu.memory_space<vmem>>, vector<16x128xf32>
    %cst = arith.constant 3.000000e+00 : f32
    %1 = vector.broadcast %cst : f32 to vector<16x128xf32>
    %2 = arith.addf %0, %1 : vector<16x128xf32>
    %cst_1 = arith.constant 0.000000e+00 : f32
    %cst_2 = arith.constant 6.000000e+00 : f32
    %3 = vector.broadcast %cst_1 : f32 to vector<16x128xf32>
    %4 = arith.maximumf %3, %2 : vector<16x128xf32>
    %5 = vector.broadcast %cst_2 : f32 to vector<16x128xf32>
    %6 = arith.minimumf %5, %4 : vector<16x128xf32>
    %7 = arith.mulf %0, %6 : vector<16x128xf32>
    %cst_3 = arith.constant 6.000000e+00 : f32
    %8 = vector.broadcast %cst_3 : f32 to vector<16x128xf32>
    %9 = arith.divf %7, %8 : vector<16x128xf32>
    %c0_4 = arith.constant 0 : index
    %c0_5 = arith.constant 0 : index
    %10 = vector.load %arg2[%c0_4, %c0_5] : memref<16x128xf32, #tpu.memory_space<vmem>>, vector<16x128xf32>
    tpu.vector_store %arg2[%c0_4, %c0_5], %9 {strides = array<i32>} : memref<16x128xf32, #tpu.memory_space<vmem>>, vector<16x128xf32>,
    return
  }
  func.func @transform_0(%arg0: i32) -> (i32, i32) {
    %c0_i32 = arith.constant 0 : i32
    %c0_i32_0 = arith.constant 0 : i32
    return %arg0, %c0_i32 : i32, i32
  }
  func.func @transform_1(%arg0: i32) -> (i32, i32) {
    %c0_i32 = arith.constant 0 : i32
    %c0_i32_0 = arith.constant 0 : i32
    return %arg0, %c0_i32 : i32, i32
  }
}

</mosaic_0001>

<bundles_post_ra>
// kernel: tpu_custom_call.1
= control target key start
LH: loop header
LB: loop body
LE: loop exit
PB: predicated region body
PF: predicated region fallthrough
CT: control target
= control target key end

     0   :  { %6 = vsyncpa [#allocation3], 0  ;;  %s151_s0 = inlined_call_operand.hbm [shape: f32[16,128], index: 0, kind: input, shape index: {}]   ;;  %s152_s1 = inlined_call_operand.hbm [shape: f32[16,128], index: 1, kind: output, shape index: {}]  }
   0x1   :  { %7 = vsyncpa [#allocation4], 0  ;;  %s107_s6 = smov [#allocation2]   ;;  %s59_s10 = scalar_lea.hbm %s151_s0, 256 }
   0x2   :  { %s13_s7 = sshll.u32 %s107_s6, 4  ;;  %p60_p0 = scmp.ne.s32.totalorder %s151_s0, %s59_s10  ;;  %s14_s7 = int_to_ptr.vmem [resolvable:$true] %s13_s7 }
   0x3   :  { %p63_p1 = scmp.lt.u32.totalorder %s59_s10, %s151_s0 }
   0x5   :  { %p65_p2 = pnand %p63_p1, %p60_p0 }
   0x7   :  { %68 = shalt.err (!%p65_p2)
}
   0x8   :  { %s69_s15 = scalar_lea.vmem %s14_s7, 256  ;;  %p74_p4 = scmp.lt.s32.totalorder %s14_s7, %s14_s7 }
   0x9   :  { %p70_p3 = scmp.ne.s32.totalorder %s14_s7, %s69_s15  ;;  %p75_p5 = scmp.lt.s32.totalorder %s69_s15, %s69_s15 }
   0xb   :  { %p76_p6 = por %p75_p5, %p74_p4 }
   0xd   :  { %p77_p7 = pnand %p76_p6, %p70_p3 }
   0xf   :  { %80 = shalt.err (!%p77_p7)
}
  0x10   :  { %s108_s16 = smov 128   ;;  %s109_s17 = smov 8  }
  0x11   :  { %19 = dma.hbm_to_vmem [thread:$0]  %s151_s0, 256, %s14_s7, [#allocation3], %s108_s16, %s108_s16, %s109_s17  }
  0x12   :  { %103 = dma.done.wait [#allocation3], 256  }
  0x13   :  { %104 = vsyncadd [#allocation3], 4294967040  ;;  %v23_v0 = vld [vmem:[#allocation2] sm:$0xff]  ;;  %v24_v1 = vld [vmem:[#allocation2 + $0x8] sm:$0xff]  ;;  %s110_s20 = smov [#allocation5]  }
  0x14   :  { %v25_v2 = vadd.f32 3.0, %v23_v0  ;;  %v26_v3 = vadd.f32 3.0, %v24_v1  ;;  %s43_s21 = sshll.u32 %s110_s20, 4  ;;  %s44_s21 = int_to_ptr.vmem [resolvable:$true] %s43_s21 }
  0x15   :  { %s81_s0 = scalar_lea.vmem %s44_s21, 256  ;;  %p86_p9 = scmp.lt.s32.totalorder %s44_s21, %s44_s21 }
  0x16   :  { %v27_v4 = vmax.f32 %v25_v2, 0.0  ;;  %v28_v5 = vmax.f32 %v26_v3, 0.0  ;;  %p82_p8 = scmp.ne.s32.totalorder %s44_s21, %s81_s0  ;;  %p87_p10 = scmp.lt.s32.totalorder %s81_s0, %s81_s0 }
  0x18   :  { %v29_v6 = vmin.f32 %v27_v4, 6.0  ;;  %v30_v7 = vmin.f32 %v28_v5, 6.0  ;;  %p88_p11 = por %p87_p10, %p86_p9 }
  0x1a   :  { %v31_v8 = vmul.f32 %v29_v6, %v23_v0  ;;  %v32_v9 = vmul.f32 %v30_v7, %v24_v1  ;;  %p89_p12 = pnand %p88_p11, %p82_p8 }
  0x1c   :  { %v34_v10 = vmul.f32 0.16666667, %v31_v8  ;;  %v35_v11 = vmul.f32 0.16666667, %v32_v9 }
  0x1e   :  { %36 = vst [vmem:[#allocation5] sm:$0xff] %v34_v10  ;;  %37 = vst [vmem:[#allocation5 + $0x8] sm:$0xff] %v35_v11 }
  0x1f   :  { %92 = shalt.err (!%p89_p12)
}
  0x20   :  { %s93_s24 = scalar_lea.hbm %s152_s1, 256 }
  0x21   :  { %p94_p13 = scmp.ne.s32.totalorder %s152_s1, %s93_s24  ;;  %p97_p0 = scmp.lt.u32.totalorder %s93_s24, %s152_s1 }
  0x23   :  { %p99_p1 = pnand %p97_p0, %p94_p13 }
  0x25   :  { %102 = shalt.err (!%p99_p1)
}
  0x26   :  { %49 = dma.vmem_to_hbm [thread:$0]  %s44_s21, 256, %s152_s1, [#allocation4], %s108_s16, %s108_s16, %s109_s17  }
  0x27   :  { %105 = dma.done.wait [#allocation4], 256  }
  0x28   :  { %106 = vsyncadd [#allocation4], 4294967040 }
  0x29   :  { %53 = vsyncpa [#allocation3], 1 }
  0x2a   :  { %54 = vsyncpa [#allocation4], 1 }

</bundles_post_ra>
